<compile_context>
chip_gen: v5e
topology: v5e:2x2
jax: 0.10.0
libtpu: 0.0.40
codegen_flags: <defaults>
</compile_context>

<pallas_src>
import functools

import jax
import jax.numpy as jnp
from jax.experimental import pallas as pl
from jax.experimental.pallas import tpu as pltpu

_EPS = 1e-5


# ----------------------------------------------------------------------------
# Kernels
# ----------------------------------------------------------------------------
def _ln_general_kernel(x_ref, ab_ref, o_ref, *, eps):
    """F is the full lane dim; stats via XLU lane reductions (two-pass)."""
    x = x_ref[...].astype(jnp.float32)                 # (rows_tile, F)
    f = x.shape[-1]
    a = ab_ref[0:1, :]                                 # (1, F) f32
    b = ab_ref[1:2, :]

    mean = jnp.sum(x, axis=-1, keepdims=True) * (1.0 / f)
    centered = x - mean
    var = jnp.sum(centered * centered, axis=-1, keepdims=True) * (1.0 / max(f - 1, 1))
    inv = pl.reciprocal(jnp.sqrt(var) + eps, approx=False)   # EUP slot

    if o_ref.dtype == jnp.bfloat16:
        # Keep stats f32 but do the wide normalize in packed bf16 (v7x VALU relief).
        xo = x_ref[...]
        dt = xo.dtype
        o_ref[...] = (xo - mean.astype(dt)) * inv.astype(dt) * a.astype(dt) + b.astype(dt)
    else:
        o_ref[...] = (centered * inv * a + b).astype(o_ref.dtype)


def _ln_packed_kernel(x_ref, ab_ref, blk_ref, o_ref, *, feat, eps):
    """k rows packed per vreg row; per-segment stats via block-diag matmul (MXU)."""
    x = x_ref[...].astype(jnp.float32)                 # (rows_tile, k*feat)
    blk = blk_ref[...]                                 # (k*feat, k*feat) block-diag ones
    a = ab_ref[0:1, :]
    b = ab_ref[1:2, :]

    # x @ blk -> per-segment sums, already broadcast across each segment's lanes.
    s1 = jnp.dot(x, blk, preferred_element_type=jnp.float32)
    mean = s1 * (1.0 / feat)
    centered = x - mean
    s2 = jnp.dot(centered * centered, blk, preferred_element_type=jnp.float32)
    var = s2 * (1.0 / max(feat - 1, 1))
    inv = pl.reciprocal(jnp.sqrt(var) + eps, approx=False)

    if o_ref.dtype == jnp.bfloat16:
        xo = x_ref[...]
        dt = xo.dtype
        o_ref[...] = (xo - mean.astype(dt)) * inv.astype(dt) * a.astype(dt) + b.astype(dt)
    else:
        o_ref[...] = (centered * inv * a + b).astype(o_ref.dtype)


# ----------------------------------------------------------------------------
# Tiling helpers
# ----------------------------------------------------------------------------
@functools.lru_cache(maxsize=1)
def _vmem_capacity_bytes():
    try:
        return int(pltpu.get_tpu_info().vmem_capacity_bytes)
    except Exception:
        return 64 << 20   # conservative (v7x-sized) fallback


def _row_align(itemsize):
    return max(8, 32 // max(itemsize, 1))   # 8 f32, 16 bf16, 32 int8


def _choose_rows_tile(n_rows, lane_width, itemsize, vmem_cap_bytes):
    """Large VMEM-budgeted row tile, sublane-aligned, >=2 grid steps when possible."""
    row_align = _row_align(itemsize)
    if n_rows <= row_align:
        return n_rows                      # single full-extent block, no padding games
    # Generation-aware budget: roomier on 128-MiB-VMEM parts, tighter on v7x.
    target = (8 << 20) if vmem_cap_bytes >= (96 << 20) else (3 << 20)
    rows = max(row_align, target // max(lane_width * itemsize, 1))
    rows = (rows // row_align) * row_align
    rows_cap = ((n_rows + row_align - 1) // row_align) * row_align
    rows = min(rows, rows_cap)
    if rows >= n_rows:
        # Keep at least 2 grid steps so both v7x TensorCores get work.
        half = (((n_rows + 1) // 2) + row_align - 1) // row_align * row_align
        rows = max(row_align, min(rows, half))
    return rows


# ----------------------------------------------------------------------------
# Wrapper
# ----------------------------------------------------------------------------
@functools.partial(jax.jit, static_argnames=("eps", "rows_tile"))
def layer_norm(x, a_2, b_2, *, eps=_EPS, rows_tile=None):
    """x: (..., F). a_2, b_2: (F,). Same semantics as the PyTorch module."""
    orig_shape = x.shape
    F = orig_shape[-1]
    x2d = x.reshape(-1, F)
    R = x2d.shape[0]
    itemsize = jnp.dtype(x.dtype).itemsize
    row_align = _row_align(itemsize)

    vmem_cap = _vmem_capacity_bytes()
    vmem_limit = min(vmem_cap * 3 // 4, 96 << 20)
    compiler_params = pltpu.CompilerParams(
        dimension_semantics=("parallel",),
        vmem_limit_bytes=int(vmem_limit),
    )

    # Lane-dense packing for small F: (R, F) -> (R//k, k*F) is a free row-major
    # reshape (no HBM traffic); per-segment stats go to the idle MXU.
    k = (128 // F) if (F < 128 and 128 % F == 0) else 1
    packed = (k > 1) and (R % k == 0) and ((R // k) >= row_align)

    if packed:
        lane_w = k * F
        n_rows = R // k
        xk = x2d.reshape(n_rows, lane_w)
        ab = jnp.stack([jnp.tile(a_2, k), jnp.tile(b_2, k)], axis=0).astype(jnp.float32)
        seg = jnp.arange(lane_w, dtype=jnp.int32) // F
        blk = (seg[:, None] == seg[None, :]).astype(jnp.float32)   # (k*F, k*F)

        rt = rows_tile if rows_tile is not None else _choose_rows_tile(
            n_rows, lane_w, itemsize, vmem_cap)
        out = pl.pallas_call(
            functools.partial(_ln_packed_kernel, feat=F, eps=eps),
            out_shape=jax.ShapeDtypeStruct((n_rows, lane_w), x.dtype),
            grid_spec=pltpu.PrefetchScalarGridSpec(
                num_scalar_prefetch=0,
                grid=(pl.cdiv(n_rows, rt),),
                in_specs=[
                    pl.BlockSpec((rt, lane_w), lambda i: (i, 0)),
                    pl.BlockSpec((2, lane_w), lambda i: (0, 0)),       # VMEM-resident
                    pl.BlockSpec((lane_w, lane_w), lambda i: (0, 0)),  # VMEM-resident
                ],
                out_specs=pl.BlockSpec((rt, lane_w), lambda i: (i, 0)),
            ),
            compiler_params=compiler_params,
        )(xk, ab, blk)
        return out.reshape(orig_shape)

    # General path (F is the full lane dim; fine for F >= 128 or un-packable shapes).
    ab = jnp.stack([a_2, b_2], axis=0).astype(jnp.float32)
    rt = rows_tile if rows_tile is not None else _choose_rows_tile(
        R, F, itemsize, vmem_cap)
    out = pl.pallas_call(
        functools.partial(_ln_general_kernel, eps=eps),
        out_shape=jax.ShapeDtypeStruct((R, F), x.dtype),
        grid_spec=pltpu.PrefetchScalarGridSpec(
            num_scalar_prefetch=0,
            grid=(pl.cdiv(R, rt),),
            in_specs=[
                pl.BlockSpec((rt, F), lambda i: (i, 0)),
                pl.BlockSpec((2, F), lambda i: (0, 0)),   # VMEM-resident scale/shift
            ],
            out_specs=pl.BlockSpec((rt, F), lambda i: (i, 0)),
        ),
        compiler_params=compiler_params,
    )(x2d, ab)
    return out.reshape(orig_shape)


# ----------------------------------------------------------------------------
# Demo / self-check
# ----------------------------------------------------------------------------
if __name__ == "__main__":
    key = jax.random.PRNGKey(0)
    hidden = 32
    a_2 = jnp.ones((hidden,), dtype=jnp.float32)
    b_2 = jnp.zeros((hidden,), dtype=jnp.float32)

    def ref_ln(x, a, b):
        mean = jnp.mean(x, axis=-1, keepdims=True)
        std = jnp.std(x, axis=-1, keepdims=True, ddof=1)   # torch.std: unbiased
        return a * (x - mean) / (std + _EPS) + b

    # Case 1: F=32 -> lane-packed path (4 rows per 128-lane vreg row, MXU stats).
    x1 = jax.random.normal(key, (2, 16, hidden), dtype=jnp.float32)
    y1 = jax.block_until_ready(layer_norm(x1, a_2, b_2))
    assert y1.shape == x1.shape and y1.dtype == x1.dtype
    assert jnp.allclose(y1, ref_ln(x1, a_2, b_2), atol=1e-5, rtol=1e-5)

    # Case 2: F=256, ragged row count (15 rows) -> general path with a partial
    # boundary block (no jnp.pad / slice in the wrapper); shifted data checks
    # the two-pass variance accuracy.
    k2, k3 = jax.random.split(key)
    a_2b = jax.random.normal(k2, (256,), dtype=jnp.float32)
    b_2b = jax.random.normal(k3, (256,), dtype=jnp.float32)
    x2 = jax.random.normal(key, (3, 5, 256), dtype=jnp.float32) * 2.0 + 3.0
    y2 = jax.block_until_ready(layer_norm(x2, a_2b, b_2b))
    assert jnp.allclose(y2, ref_ln(x2, a_2b, b_2b), atol=1e-4, rtol=1e-4)

    # Case 3: F=32 with too few rows to pack -> general small-F fallback, ragged rows.
    x3 = jax.random.normal(key, (2, 10, hidden), dtype=jnp.float32)
    y3 = jax.block_until_ready(layer_norm(x3, a_2, b_2))
    assert jnp.allclose(y3, ref_ln(x3, a_2, b_2), atol=1e-5, rtol=1e-5)

    print("KERNEL_OK")
</pallas_src>

<mosaic_0001>
module attributes {stable_mosaic.version = 11 : i64} {
  func.func @_ln_packed_kernel(%arg0: i32, %arg1: memref<8x128xf32, #tpu.memory_space<vmem>>, %arg2: memref<2x128xf32, #tpu.memory_space<vmem>>, %arg3: memref<128x128xf32, #tpu.memory_space<vmem>>, %arg4: memref<8x128xf32, #tpu.memory_space<vmem>>) attributes {dimension_semantics = [#tpu.dimension_semantics<parallel>], iteration_bounds = array<i64: 1>, scalar_prefetch = 0 : i64, scratch_operands = 0 : i64, tpu.core_type = #tpu.core_type<tc>, window_params = [{transform_indices = @transform_0, window_bounds = array<i64: 8, 128>}, {pipeline_mode = #tpu.pipeline_mode<synchronous>, transform_indices = @transform_1, window_bounds = array<i64: 2, 128>}, {pipeline_mode = #tpu.pipeline_mode<synchronous>, transform_indices = @transform_2, window_bounds = array<i64: 128, 128>}, {transform_indices = @transform_3, window_bounds = array<i64: 8, 128>}]} {
    %c0 = arith.constant 0 : index
    %c0_0 = arith.constant 0 : index
    %0 = vector.load %arg1[%c0, %c0_0] : memref<8x128xf32, #tpu.memory_space<vmem>>, vector<8x128xf32>
    %c0_1 = arith.constant 0 : index
    %c0_2 = arith.constant 0 : index
    %1 = vector.load %arg3[%c0_1, %c0_2] : memref<128x128xf32, #tpu.memory_space<vmem>>, vector<128x128xf32>
    %c0_3 = arith.constant 0 : index
    %c0_4 = arith.constant 0 : index
    %2 = vector.load %arg2[%c0_3, %c0_4] : memref<2x128xf32, #tpu.memory_space<vmem>>, vector<1x128xf32>
    %c1 = arith.constant 1 : index
    %c0_5 = arith.constant 0 : index
    %3 = vector.load %arg2[%c1, %c0_5] : memref<2x128xf32, #tpu.memory_space<vmem>>, vector<1x128xf32>
    %cst = arith.constant dense<0.000000e+00> : vector<8x128xf32>
    %4 = tpu.matmul %0, %1, %cst {dimension_numbers = #tpu.dot_dimension_numbers<[1], [0], [0], [1], [0, 0, 1, 1], [], []>} : vector<8x128xf32>, vector<128x128xf32>, vector<8x128xf32> -> vector<8x128xf32>
    %cst_6 = arith.constant 3.125000e-02 : f32
    %5 = vector.broadcast %cst_6 : f32 to vector<8x128xf32>
    %6 = arith.mulf %4, %5 : vector<8x128xf32>
    %7 = arith.subf %0, %6 : vector<8x128xf32>
    %8 = arith.mulf %7, %7 : vector<8x128xf32>
    %cst_7 = arith.constant dense<0.000000e+00> : vector<8x128xf32>
    %9 = tpu.matmul %8, %1, %cst_7 {dimension_numbers = #tpu.dot_dimension_numbers<[1], [0], [0], [1], [0, 0, 1, 1], [], []>} : vector<8x128xf32>, vector<128x128xf32>, vector<8x128xf32> -> vector<8x128xf32>
    %cst_8 = arith.constant 0.0322580636 : f32
    %10 = vector.broadcast %cst_8 : f32 to vector<8x128xf32>
    %11 = arith.mulf %9, %10 : vector<8x128xf32>
    %12 = math.sqrt %11 : vector<8x128xf32>
    %cst_9 = arith.constant 9.99999974E-6 : f32
    %13 = vector.broadcast %cst_9 : f32 to vector<8x128xf32>
    %14 = arith.addf %12, %13 : vector<8x128xf32>
    %15 = tpu.reciprocal %14 : vector<8x128xf32> -> vector<8x128xf32>
    %16 = arith.mulf %7, %15 : vector<8x128xf32>
    %17 = vector.broadcast %2 : vector<1x128xf32> to vector<8x128xf32>
    %18 = arith.mulf %16, %17 : vector<8x128xf32>
    %19 = vector.broadcast %3 : vector<1x128xf32> to vector<8x128xf32>
    %20 = arith.addf %18, %19 : vector<8x128xf32>
    %c0_10 = arith.constant 0 : index
    %c0_11 = arith.constant 0 : index
    %21 = vector.load %arg4[%c0_10, %c0_11] : memref<8x128xf32, #tpu.memory_space<vmem>>, vector<8x128xf32>
    tpu.vector_store %arg4[%c0_10, %c0_11], %20 {strides = array<i32>} : memref<8x128xf32, #tpu.memory_space<vmem>>, vector<8x128xf32>,
    return
  }
  func.func @transform_0(%arg0: i32) -> (i32, i32) {
    %c0_i32 = arith.constant 0 : i32
    %c0_i32_0 = arith.constant 0 : i32
    return %arg0, %c0_i32 : i32, i32
  }
  func.func @transform_1(%arg0: i32) -> (i32, i32) {
    %c0_i32 = arith.constant 0 : i32
    %c0_i32_0 = arith.constant 0 : i32
    %c0_i32_1 = arith.constant 0 : i32
    return %c0_i32, %c0_i32_0 : i32, i32
  }
  func.func @transform_2(%arg0: i32) -> (i32, i32) {
    %c0_i32 = arith.constant 0 : i32
    %c0_i32_0 = arith.constant 0 : i32
    %c0_i32_1 = arith.constant 0 : i32
    return %c0_i32, %c0_i32_0 : i32, i32
  }
  func.func @transform_3(%arg0: i32) -> (i32, i32) {
    %c0_i32 = arith.constant 0 : i32
    %c0_i32_0 = arith.constant 0 : i32
    return %arg0, %c0_i32 : i32, i32
  }
}

</mosaic_0001>

<bundles_post_ra>
// kernel: tile.13
= control target key start
LH: loop header
LB: loop body
LE: loop exit
PB: predicated region body
PF: predicated region fallthrough
CT: control target
= control target key end

     0   :  { %s22_s0 = inlined_call_operand.vmem [shape: f32[32], index: 0, kind: input, shape index: {}]   ;;  %s23_s1 = inlined_call_operand.vmem [shape: f32[4,32], index: 1, kind: output, shape index: {}]  }
   0x1   :  { %v4_v0 = vld [vmem:[%s22_s0] ss:$0 sm:$0xff] }
   0x2   :  { %5 = vst [vmem:[%s23_s1] sm:$0xf] %v4_v0 }

// kernel: tile.18
= control target key start
LH: loop header
LB: loop body
LE: loop exit
PB: predicated region body
PF: predicated region fallthrough
CT: control target
= control target key end

     0   :  { %s37_s8 = smov 32   ;;  %s38_s9 = smov 64   ;;  %vm7_vm0 = vcmask 261120   ;;  %vm13_vm1 = vcmask 1048320   ;;  %vm19_vm2 = vcmask 785920   ;;  %vm25_vm3 = vcmask 523520   ;;  %s55_s0 = inlined_call_operand.vmem [shape: f32[4,32], index: 0, kind: input, shape index: {}]   ;;  %s56_s1 = inlined_call_operand.vmem [shape: f32[1,128], index: 1, kind: output, shape index: {}]  }
   0x1   :  { %v4_v0 = vld [vmem:[%s55_s0] sm:$0xf]  ;;  %s36_s0 = smov 96  }
   0x2   :  { %5 = vst [vmem:[#allocation1] sm:$0xf] %v4_v0 }
   0x9   :  { %v10_v1 = vld [vmem:[#allocation1 + $0x3] sm:$0x1]   ;;  %v22_v2 = vld [vmem:[#allocation1 + $0x1] sm:$0x1]   ;;  %v16_v3 = vld [vmem:[#allocation1 + $0x2] sm:$0x1]  }
   0xa   :  { %11 = vrot.lane.b32.xlu0 %v10_v1, %s36_s0  ;;  %23 = vrot.lane.b32.xlu1 %v22_v2, %s37_s8  ;;  %v6_v4 = vld [vmem:[#allocation1] sm:$0x1]  }
   0xb   :  { %8 = vst.msk [vmem:[#allocation0] sm:$0x1] %vm7_vm0, %v6_v4  }
  0x12   :  { %17 = vrot.lane.b32.xlu0 %v16_v3, %s38_s9 }
  0x7c   :  { %v12_v5 = vpop.permute.xlu0 %11   ;;  %v24_v6 = vpop.permute.xlu1 %23  }
  0x7d   :  { %14 = vst.msk [vmem:[#allocation0] sm:$0x1] %vm13_vm1, %v12_v5  }
  0x84   :  { %v18_v7 = vpop.permute.xlu0 %17  }
  0x85   :  { %20 = vst.msk [vmem:[#allocation0] sm:$0x1] %vm19_vm2, %v18_v7  }
  0x86   :  { %26 = vst.msk [vmem:[#allocation0] sm:$0x1] %vm25_vm3, %v24_v6  }
  0x8d   :  { %v29_v8 = vld [vmem:[#allocation0] sm:$0x1] }
  0x8e   :  { %32 = vst [vmem:[%s56_s1] sm:$0x1] %v29_v8 }

// kernel: layer_norm.1
= control target key start
LH: loop header
LB: loop body
LE: loop exit
PB: predicated region body
PF: predicated region fallthrough
CT: control target
= control target key end

     0   :  { %s200_s2 = inlined_call_operand.vmem [shape: f32[128,128], index: 2, kind: input, shape index: {}]   ;;  %s201_s0 = inlined_call_operand.vmem [shape: f32[8,128], index: 0, kind: input, shape index: {}]   ;;  %s202_s1 = inlined_call_operand.vmem [shape: f32[2,128], index: 1, kind: input, shape index: {}]   ;;  %s203_s3 = inlined_call_operand.vmem [shape: f32[8,128], index: 3, kind: output, shape index: {}]  }
   0x1   :  { %v30_v0 = vld [vmem:[%s200_s2 + $0x78] sm:$0xff]  ;;  %v29_v1 = vld [vmem:[%s200_s2 + $0x70] sm:$0xff]  ;;  %v28_v2 = vld [vmem:[%s200_s2 + $0x68] sm:$0xff] }
   0x2   :  { %33 = vmatpush.msra.mxu0 %v30_v0  ;;  %56 = vmatpush.msra.mxu1 %v30_v0  ;;  %v27_v3 = vld [vmem:[%s200_s2 + $0x60] sm:$0xff]  ;;  %v26_v4 = vld [vmem:[%s200_s2 + $0x58] sm:$0xff]  ;;  %v25_v5 = vld [vmem:[%s200_s2 + $0x50] sm:$0xff] }
   0x3   :  { %v24_v6 = vld [vmem:[%s200_s2 + $0x48] sm:$0xff]  ;;  %v23_v7 = vld [vmem:[%s200_s2 + $0x40] sm:$0xff]  ;;  %v22_v8 = vld [vmem:[%s200_s2 + $0x38] sm:$0xff] }
   0x4   :  { %34 = vmatpush.msra.mxu0 %v29_v1  ;;  %57 = vmatpush.msra.mxu1 %v29_v1  ;;  %v21_v9 = vld [vmem:[%s200_s2 + $0x30] sm:$0xff]  ;;  %v20_v10 = vld [vmem:[%s200_s2 + $0x28] sm:$0xff]  ;;  %v19_v11 = vld [vmem:[%s200_s2 + $0x20] sm:$0xff] }
   0x5   :  { %v18_v12 = vld [vmem:[%s200_s2 + $0x18] sm:$0xff]  ;;  %v17_v13 = vld [vmem:[%s200_s2 + $0x10] sm:$0xff]  ;;  %v16_v14 = vld [vmem:[%s200_s2 + $0x8] sm:$0xff] }
   0x6   :  { %35 = vmatpush.msra.mxu0 %v28_v2  ;;  %58 = vmatpush.msra.mxu1 %v28_v2  ;;  %v15_v15 = vld [vmem:[%s200_s2] sm:$0xff] }
   0x7   :  { %v14_v16 = vld [vmem:[%s201_s0] sm:$0xff] }
   0x8   :  { %36 = vmatpush.msra.mxu0 %v27_v3  ;;  %59 = vmatpush.msra.mxu1 %v27_v3  ;;  %v114_v43 = vld [vmem:[%s202_s1] ss:$0 sm:$0xff]  ;;  %v115_v46 = vld [vmem:[%s202_s1 + $0x1] ss:$0 sm:$0xff] }
   0xa   :  { %37 = vmatpush.msra.mxu0 %v26_v4  ;;  %60 = vmatpush.msra.mxu1 %v26_v4 }
   0xc   :  { %38 = vmatpush.msra.mxu0 %v25_v5  ;;  %61 = vmatpush.msra.mxu1 %v25_v5 }
   0xe   :  { %39 = vmatpush.msra.mxu0 %v24_v6  ;;  %62 = vmatpush.msra.mxu1 %v24_v6 }
  0x10   :  { %40 = vmatpush.msra.mxu0 %v23_v7  ;;  %63 = vmatpush.msra.mxu1 %v23_v7 }
  0x12   :  { %41 = vmatpush.msra.mxu0 %v22_v8  ;;  %64 = vmatpush.msra.mxu1 %v22_v8 }
  0x14   :  { %42 = vmatpush.msra.mxu0 %v21_v9  ;;  %65 = vmatpush.msra.mxu1 %v21_v9 }
  0x16   :  { %43 = vmatpush.msra.mxu0 %v20_v10  ;;  %66 = vmatpush.msra.mxu1 %v20_v10 }
  0x18   :  { %44 = vmatpush.msra.mxu0 %v19_v11  ;;  %67 = vmatpush.msra.mxu1 %v19_v11 }
  0x1a   :  { %45 = vmatpush.msra.mxu0 %v18_v12  ;;  %68 = vmatpush.msra.mxu1 %v18_v12 }
  0x1c   :  { %46 = vmatpush.msra.mxu0 %v17_v13  ;;  %69 = vmatpush.msra.mxu1 %v17_v13 }
  0x1e   :  { %47 = vmatpush.msra.mxu0 %v16_v14  ;;  %70 = vmatpush.msra.mxu1 %v16_v14 }
  0x20   :  { %48 = vmatpush.msra.mxu0 %v15_v15  ;;  %71 = vmatpush.msra.mxu1 %v15_v15 }
  0x21   :  { %49 = vmatmul.f32.vlgmr.msra.gmra.mxu0 %v14_v16 }
  0x9e   :  { %v50_v17 = vpop.f32.mrf.mxu0 }
  0x9f   :  { %v53_v18 = vmul.f32 0.03125, %v50_v17 }
  0xa1   :  { %v54_v19 = vsub.f32 %v14_v16, %v53_v18 }
  0xa3   :  { %v55_v20 = vmul.f32 %v54_v19, %v54_v19 }
  0xa5   :  { %72 = vmatmul.f32.vlgmr.msra.gmra.mxu1 %v55_v20 }
 0x122   :  { %v73_v21 = vpop.f32.mrf.mxu1 }
 0x123   :  { %v76_v22 = vmul.f32 0.032258064, %v73_v21 }
 0x125   :  { %116 = vrsqrt.f32 %v76_v22  ;;  %vm84_vm0 = vcmp.eq.f32.partialorder %v76_v22, inf  ;;  %v87_v30 = vand.u32 2147483648, %v76_v22  ;;  %vm86_vm1 = vcmp.eq.f32.partialorder %v76_v22, 0.0 }
 0x12b   :  { %v117_v23 = vpop.eup %116 }
 0x12c   :  { %v78_v24 = vmul.f32 %v117_v23, %v76_v22 }
 0x12e   :  { %v79_v25 = vmul.f32 %v117_v23, %v78_v24 }
 0x130   :  { %v80_v26 = vmul.f32 0.5, %v79_v25 }
 0x132   :  { %v81_v27 = vsub.f32 1.5, %v80_v26 }
 0x134   :  { %v82_v28 = vmul.f32 %v117_v23, %v81_v27 }
 0x136   :  { %v83_v29 = vmul.f32 %v82_v28, %v76_v22 }
 0x138   :  { %v85_v31 = vsel %vm84_vm0, %v76_v22, %v83_v29 }
 0x139   :  { %v88_v32 = vsel %vm86_vm1, %v87_v30, %v85_v31 }
 0x13a   :  { %v89_v33 = vadd.f32 1e-05, %v88_v32 }
 0x13c   :  { %118 = vrcp.f32 %v89_v33  ;;  %v101_v37 = vand.u32 2147483648, %v89_v33  ;;  %v99_v39 = vand.u32 2147483647, %v89_v33  ;;  %vm95_vm3 = vweird.f32 %v89_v33 }
 0x13e   :  { %v102_v41 = vor.u32 1.1754944e-38, %v101_v37  ;;  %vm100_vm5 = vcmp.eq.f32.partialorder %v99_v39, 8.507059e+37 }
 0x142   :  { %v119_v34 = vpop.eup %118 }
 0x143   :  { %v91_v35 = vmul.f32 %v119_v34, %v89_v33  ;;  %vm96_vm2 = vweird.f32 %v119_v34 }
 0x144   :  { %vm97_vm4 = vmor %vm95_vm3, %vm96_vm2 }
 0x145   :  { %v92_v36 = vsub.f32 1.0, %v91_v35 }
 0x147   :  { %v93_v38 = vmul.f32 %v119_v34, %v92_v36 }
 0x149   :  { %v94_v40 = vadd.f32 %v119_v34, %v93_v38 }
 0x14b   :  { %v98_v42 = vsel %vm97_vm4, %v119_v34, %v94_v40 }
 0x14c   :  { %v103_v44 = vsel %vm100_vm5, %v102_v41, %v98_v42 }
 0x14d   :  { %v104_v45 = vmul.f32 %v103_v44, %v54_v19 }
 0x14f   :  { %v106_v47 = vmul.f32 %v114_v43, %v104_v45 }
 0x151   :  { %v108_v48 = vadd.f32 %v115_v46, %v106_v47 }
 0x153   :  { %109 = vst [vmem:[%s203_s3] sm:$0xff] %v108_v48 }

</bundles_post_ra>
